<compile_context>
chip_gen: v7x
topology: tpu7x:2x2x1
jax: 0.10.0
libtpu: 0.0.40
codegen_flags: <defaults>
</compile_context>

<pallas_src>
import functools
import math

import jax
import jax.numpy as jnp
from jax.experimental import pallas as pl
from jax.experimental.pallas import tpu as pltpu

_LANE = 128


def _round_up(x: int, m: int) -> int:
    return ((x + m - 1) // m) * m


def _vmem_capacity_bytes() -> int:
    try:
        return int(pltpu.get_tpu_info().vmem_capacity_bytes)
    except Exception:
        return 64 * 1024 * 1024  # be conservative: v7x per-TensorCore VMEM


def _choose_row_tile(rows: int, lane_width: int, in_dtype, out_dtype) -> int:
    """Row tile sized by bytes (not a fixed row cap), accounting for the f32
    block temporaries, with headroom for v7x's 64 MiB VMEM and a split cap so
    the grid keeps multiple steps for megacore sharding / pipelining."""
    in_b = jnp.dtype(in_dtype).itemsize
    out_b = jnp.dtype(out_dtype).itemsize
    # sublane packing of the input dtype: 8 rows (32-bit), 16 (16-bit), 32 (8-bit)
    packing = max(8, 32 // max(in_b, 1))

    # Per-row VMEM footprint of one grid step:
    #   double-buffered input + output blocks, plus the full-block f32
    #   temporaries (xf and hs) the two-pass body keeps live (single-buffered).
    bytes_per_row = lane_width * (2 * (in_b + out_b) + 8)

    vmem_cap = _vmem_capacity_bytes()
    budget = min(32 * 1024 * 1024, vmem_cap // 4)   # 32 MiB on 128 MiB chips, 16 MiB on v7x

    tile = max(packing, budget // max(bytes_per_row, 1))
    tile = (tile // packing) * packing

    # Keep the grid at >= 4 (or >= 2) steps when rows allow it, so the
    # "parallel" axis actually shards across v7x's two TensorCores and the
    # pipeline has something to overlap.  v5e/v6e only pay tiny step overhead.
    if rows >= 4 * packing:
        tile = min(tile, _round_up(pl.cdiv(rows, 4), packing))
    elif rows >= 2 * packing:
        tile = min(tile, _round_up(pl.cdiv(rows, 2), packing))

    needed = _round_up(rows, packing)
    return max(packing, min(tile, needed))


def _rmsnorm_kernel(x_ref, w_ref, o_ref, *, eps: float):
    # x_ref: (row_tile, hidden), w_ref: (1, hidden), o_ref: (row_tile, hidden)
    x = x_ref[...]
    xf = x.astype(jnp.float32)                              # single cast, reused
    variance = jnp.mean(xf * xf, axis=-1, keepdims=True)    # f32, matches torch
    inv_rms = jax.lax.rsqrt(variance + eps)                 # f32
    hs = xf * inv_rms                                       # f32
    w = w_ref[...]
    # torch: if weight is fp16/bf16, cast hidden_states to weight dtype first.
    if w.dtype in (jnp.float16, jnp.bfloat16):
        hs = hs.astype(w.dtype)
    o_ref[...] = (w * hs).astype(o_ref.dtype)


def _rmsnorm_folded_kernel(x_ref, w_ref, seg_ref, o_ref, *, eps: float, hidden: int):
    # x_ref: (row_tile, 128) where each 128-lane row holds g = 128//hidden
    # original rows back to back.  seg_ref: (128, 128) block-diagonal ones.
    x = x_ref[...]
    xf = x.astype(jnp.float32)
    sq = xf * xf
    # Per-segment lane sums via one MXU matmul; the result is already broadcast
    # across each segment's lanes.  MXU is otherwise idle, so this is free.
    seg_sum = jnp.dot(sq, seg_ref[...], preferred_element_type=jnp.float32)
    variance = seg_sum * (1.0 / float(hidden))
    inv_rms = jax.lax.rsqrt(variance + eps)
    hs = xf * inv_rms
    w = w_ref[...]
    if w.dtype in (jnp.float16, jnp.bfloat16):
        hs = hs.astype(w.dtype)
    o_ref[...] = (w * hs).astype(o_ref.dtype)


def idefics_rms_norm(hidden_states: jax.Array,
                     weight: jax.Array,
                     eps: float = 1e-6,
                     row_tile: int | None = None) -> jax.Array:
    """RMSNorm over the last axis with torch IdeficsRMSNorm semantics."""
    orig_shape = hidden_states.shape
    hidden = orig_shape[-1]
    rows = math.prod(orig_shape[:-1]) if len(orig_shape) > 1 else 1

    w_is_half = weight.dtype in (jnp.dtype(jnp.float16), jnp.dtype(jnp.bfloat16))
    # torch output dtype: weight.dtype if weight is half, else f32-promoted.
    out_dtype = weight.dtype if w_is_half else jnp.promote_types(jnp.float32,
                                                                 weight.dtype)

    x2d = hidden_states.reshape(rows, hidden)

    # Lane-dense fold path for small hidden (avoids masked vst.msk stores and
    # ~4x wasted lane bandwidth at e.g. hidden=32).
    fold = (hidden < _LANE and _LANE % hidden == 0 and rows > 0
            and rows % (_LANE // hidden) == 0)

    if fold:
        g = _LANE // hidden
        n_rows = rows // g
        lane_width = _LANE
        x2d = x2d.reshape(n_rows, _LANE)
        w2d = jnp.tile(weight.reshape(1, hidden), (1, g))
        lane_ids = jnp.arange(_LANE)
        seg = (lane_ids[:, None] // hidden == lane_ids[None, :] // hidden
               ).astype(jnp.float32)                         # (128,128) resident
        kernel = functools.partial(_rmsnorm_folded_kernel, eps=eps, hidden=hidden)
        if row_tile is None:
            row_tile = _choose_row_tile(n_rows, lane_width, x2d.dtype, out_dtype)
        in_specs = [
            pl.BlockSpec((row_tile, lane_width), lambda i: (i, 0)),
            pl.BlockSpec((1, lane_width), lambda i: (0, 0)),      # resident weight
            pl.BlockSpec((_LANE, _LANE), lambda i: (0, 0)),       # resident seg mat
        ]
        args = (x2d, w2d, seg)
    else:
        # TODO(synk): hidden >= 128 but not a multiple of 128 (or small hidden
        # with rows not divisible by the fold factor) uses masked lane stores.
        n_rows = rows
        lane_width = hidden
        w2d = weight.reshape(1, hidden)
        kernel = functools.partial(_rmsnorm_kernel, eps=eps)
        if row_tile is None:
            row_tile = _choose_row_tile(n_rows, lane_width, x2d.dtype, out_dtype)
        in_specs = [
            pl.BlockSpec((row_tile, lane_width), lambda i: (i, 0)),
            pl.BlockSpec((1, lane_width), lambda i: (0, 0)),      # resident weight
        ]
        args = (x2d, w2d)

    grid = (pl.cdiv(n_rows, row_tile),)

    # Scoped-VMEM request: 48 MiB on 128 MiB chips (v5e/v6e), 32 MiB on v7x.
    vmem_limit = min(48 * 1024 * 1024, _vmem_capacity_bytes() // 2)

    # TODO(synk): further gains require producer/consumer fusion (fold the
    # residual add / emit the dtype the next matmul consumes) at the call site;
    # this kernel is HBM-bandwidth bound.
    out = pl.pallas_call(
        kernel,
        out_shape=jax.ShapeDtypeStruct((n_rows, lane_width), out_dtype),
        grid_spec=pltpu.PrefetchScalarGridSpec(
            num_scalar_prefetch=0,
            grid=grid,
            in_specs=in_specs,
            out_specs=pl.BlockSpec((row_tile, lane_width), lambda i: (i, 0)),
        ),
        compiler_params=pltpu.CompilerParams(
            dimension_semantics=("parallel",),
            vmem_limit_bytes=vmem_limit),
    )(*args)

    return out.reshape(orig_shape)


def _reference(hidden_states, weight, eps=1e-6):
    xf = hidden_states.astype(jnp.float32)
    variance = jnp.mean(xf * xf, axis=-1, keepdims=True)
    hs = xf * jax.lax.rsqrt(variance + eps)
    if weight.dtype in (jnp.float16, jnp.bfloat16):
        hs = hs.astype(weight.dtype)
    return weight * hs


if __name__ == "__main__":
    key = jax.random.PRNGKey(0)
    k1, k2, k3, k4 = jax.random.split(key, 4)

    # 1) Module-shaped demo: (batch=2, seq=8, hidden=32), f32, weight = ones
    #    (module init).  hidden=32 < 128 and rows=16 % 4 == 0 -> fold path.
    x = jax.random.normal(k1, (2, 8, 32), dtype=jnp.float32)
    w = jnp.ones((32,), dtype=jnp.float32)
    out = jax.block_until_ready(idefics_rms_norm(x, w, eps=1e-6))
    ref = _reference(x, w, eps=1e-6)
    assert out.shape == x.shape and out.dtype == ref.dtype, (out.shape, out.dtype)
    assert jnp.allclose(out, ref, atol=1e-5, rtol=1e-5), \
        float(jnp.max(jnp.abs(out - ref)))

    # 2) Ragged rows (3*5 = 15, not divisible by the fold factor 4) -> plain
    #    path, partial last block handled by Pallas store masking.
    x2 = jax.random.normal(k2, (3, 5, 32), dtype=jnp.float32)
    out2 = jax.block_until_ready(idefics_rms_norm(x2, w, eps=1e-6))
    ref2 = _reference(x2, w, eps=1e-6)
    assert out2.shape == x2.shape
    assert jnp.allclose(out2, ref2, atol=1e-5, rtol=1e-5), \
        float(jnp.max(jnp.abs(out2 - ref2)))

    # 3) bf16 activations + bf16 weight, lane-dense hidden=256 (plain path);
    #    exercises the half-cast-before-weight branch and bf16 out dtype.
    x3 = jax.random.normal(k3, (2, 8, 256), dtype=jnp.bfloat16)
    w3 = (1.0 + 0.1 * jax.random.normal(k4, (256,), dtype=jnp.float32)
          ).astype(jnp.bfloat16)
    out3 = jax.block_until_ready(idefics_rms_norm(x3, w3, eps=1e-6))
    ref3 = _reference(x3, w3, eps=1e-6)
    assert out3.dtype == jnp.bfloat16 and out3.shape == x3.shape
    assert jnp.allclose(out3.astype(jnp.float32), ref3.astype(jnp.float32),
                        atol=2e-2, rtol=2e-2)

    print("KERNEL_OK")
</pallas_src>

<mosaic_0001>
module attributes {stable_mosaic.version = 11 : i64} {
  func.func @_rmsnorm_folded_kernel(%arg0: i32, %arg1: memref<8x128xf32, #tpu.memory_space<vmem>>, %arg2: memref<1x128xf32, #tpu.memory_space<vmem>>, %arg3: memref<128x128xf32, #tpu.memory_space<vmem>>, %arg4: memref<8x128xf32, #tpu.memory_space<vmem>>) attributes {dimension_semantics = [#tpu.dimension_semantics<parallel>], iteration_bounds = array<i64: 1>, scalar_prefetch = 0 : i64, scratch_operands = 0 : i64, tpu.core_type = #tpu.core_type<tc>, window_params = [{transform_indices = @transform_0, window_bounds = array<i64: 8, 128>}, {pipeline_mode = #tpu.pipeline_mode<synchronous>, transform_indices = @transform_1, window_bounds = array<i64: 1, 128>}, {pipeline_mode = #tpu.pipeline_mode<synchronous>, transform_indices = @transform_2, window_bounds = array<i64: 128, 128>}, {transform_indices = @transform_3, window_bounds = array<i64: 8, 128>}]} {
    %c0 = arith.constant 0 : index
    %c0_0 = arith.constant 0 : index
    %0 = vector.load %arg1[%c0, %c0_0] : memref<8x128xf32, #tpu.memory_space<vmem>>, vector<8x128xf32>
    %1 = arith.mulf %0, %0 : vector<8x128xf32>
    %c0_1 = arith.constant 0 : index
    %c0_2 = arith.constant 0 : index
    %2 = vector.load %arg3[%c0_1, %c0_2] : memref<128x128xf32, #tpu.memory_space<vmem>>, vector<128x128xf32>
    %cst = arith.constant dense<0.000000e+00> : vector<8x128xf32>
    %3 = tpu.matmul %1, %2, %cst {dimension_numbers = #tpu.dot_dimension_numbers<[1], [0], [0], [1], [0, 0, 1, 1], [], []>} : vector<8x128xf32>, vector<128x128xf32>, vector<8x128xf32> -> vector<8x128xf32>
    %cst_3 = arith.constant 3.125000e-02 : f32
    %4 = vector.broadcast %cst_3 : f32 to vector<8x128xf32>
    %5 = arith.mulf %3, %4 : vector<8x128xf32>
    %cst_4 = arith.constant 9.99999997E-7 : f32
    %6 = vector.broadcast %cst_4 : f32 to vector<8x128xf32>
    %7 = arith.addf %5, %6 : vector<8x128xf32>
    %8 = math.rsqrt %7 : vector<8x128xf32>
    %9 = arith.mulf %0, %8 : vector<8x128xf32>
    %c0_5 = arith.constant 0 : index
    %c0_6 = arith.constant 0 : index
    %10 = vector.load %arg2[%c0_5, %c0_6] : memref<1x128xf32, #tpu.memory_space<vmem>>, vector<1x128xf32>
    %11 = vector.broadcast %10 : vector<1x128xf32> to vector<8x128xf32>
    %12 = arith.mulf %11, %9 : vector<8x128xf32>
    %c0_7 = arith.constant 0 : index
    %c0_8 = arith.constant 0 : index
    %13 = vector.load %arg4[%c0_7, %c0_8] : memref<8x128xf32, #tpu.memory_space<vmem>>, vector<8x128xf32>
    tpu.vector_store %arg4[%c0_7, %c0_8], %12 {strides = array<i32>} : memref<8x128xf32, #tpu.memory_space<vmem>>, vector<8x128xf32>,
    return
  }
  func.func @transform_0(%arg0: i32) -> (i32, i32) {
    %c0_i32 = arith.constant 0 : i32
    %c0_i32_0 = arith.constant 0 : i32
    return %arg0, %c0_i32 : i32, i32
  }
  func.func @transform_1(%arg0: i32) -> (i32, i32) {
    %c0_i32 = arith.constant 0 : i32
    %c0_i32_0 = arith.constant 0 : i32
    %c0_i32_1 = arith.constant 0 : i32
    return %c0_i32, %c0_i32_0 : i32, i32
  }
  func.func @transform_2(%arg0: i32) -> (i32, i32) {
    %c0_i32 = arith.constant 0 : i32
    %c0_i32_0 = arith.constant 0 : i32
    %c0_i32_1 = arith.constant 0 : i32
    return %c0_i32, %c0_i32_0 : i32, i32
  }
  func.func @transform_3(%arg0: i32) -> (i32, i32) {
    %c0_i32 = arith.constant 0 : i32
    %c0_i32_0 = arith.constant 0 : i32
    return %arg0, %c0_i32 : i32, i32
  }
}

</mosaic_0001>

<bundles_post_ra>
// kernel: tpu_custom_call.1
= control target key start
LH: loop header
LB: loop body
LE: loop exit
PB: predicated region body
PF: predicated region fallthrough
CT: control target
= control target key end

     0   :  { %8 = vsyncpa [#allocation3], 0  ;;  %s398_s0 = inlined_call_operand.hbm [shape: f32[4,128], index: 0, kind: input, shape index: {}]   ;;  %s399_s1 = inlined_call_operand.vmem [shape: f32[1,128], index: 1, kind: input, shape index: {}]   ;;  %s400_s2 = inlined_call_operand.hbm [shape: f32[128,128], index: 2, kind: input, shape index: {}]   ;;  %s401_s3 = inlined_call_operand.hbm [shape: f32[4,128], index: 3, kind: output, shape index: {}]  }
   0x1   :  { %9 = vsyncpa [#allocation6], 0 }
   0x2   :  { %10 = vsyncpa [#allocation4], 0 }
   0x3   :  { %15 = vsyncadd [#allocation3], 64  ;;  %s323_s12 = smov [#allocation2]   ;;  %s251_s16 = scalar_lea.hbm %s398_s0, 64 }
   0x4   :  { %s16_s13 = sshll.u32 %s323_s12, 4  ;;  %p252_p0 = scmp.ne.s32.totalorder %s398_s0, %s251_s16  ;;  %s17_s13 = int_to_ptr.vmem [resolvable:$true] %s16_s13 }
   0x5   :  { %p255_p1 = scmp.lt.u32.totalorder %s251_s16, %s398_s0 }
   0x7   :  { %p257_p2 = pnand %p255_p1, %p252_p0 }
   0x9   :  { %260 = shalt.err (!%p257_p2)
}
   0xa   :  { %s261_s21 = scalar_lea.vmem %s17_s13, 64  ;;  %s265_s22 = scalar_lea.vmem %s17_s13, 128 }
   0xb   :  { %p262_p3 = scmp.ne.s32.totalorder %s17_s13, %s261_s21  ;;  %p266_p4 = scmp.lt.s32.totalorder %s17_s13, %s17_s13 }
   0xc   :  { %p267_p5 = scmp.lt.s32.totalorder %s265_s22, %s261_s21 }
   0xe   :  { %p268_p6 = por %p267_p5, %p266_p4 }
  0x10   :  { %p269_p7 = pnand %p268_p6, %p262_p3 }
  0x12   :  { %272 = shalt.err (!%p269_p7)
}
  0x13   :  { %s324_s23 = smov 64   ;;  %s325_s24 = smov 4  }
  0x14   :  { %22 = dma.hbm_to_vmem [thread:$0]  %s398_s0, 64, %s17_s13, [#allocation3], %s324_s23, %s324_s23, %s325_s24  }
  0x15   :  { %s326_s27 = smov [#allocation5]   ;;  %s273_s4 = scalar_lea.hbm %s400_s2, 2048 }
  0x16   :  { %s30_s28 = sshll.u32 %s326_s27, 4  ;;  %p274_p8 = scmp.ne.s32.totalorder %s400_s2, %s273_s4  ;;  %s31_s28 = int_to_ptr.vmem [resolvable:$true] %s30_s28 }
  0x17   :  { %p277_p9 = scmp.lt.u32.totalorder %s273_s4, %s400_s2 }
  0x19   :  { %p279_p10 = pnand %p277_p9, %p274_p8 }
  0x1b   :  { %282 = shalt.err (!%p279_p10)
}
  0x1c   :  { %s283_s9 = scalar_lea.vmem %s31_s28, 2048  ;;  %p288_p12 = scmp.lt.s32.totalorder %s31_s28, %s31_s28 }
  0x1d   :  { %p284_p11 = scmp.ne.s32.totalorder %s31_s28, %s283_s9  ;;  %p289_p13 = scmp.lt.s32.totalorder %s283_s9, %s283_s9 }
  0x1f   :  { %p290_p0 = por %p289_p13, %p288_p12 }
  0x21   :  { %p291_p1 = pnand %p290_p0, %p284_p11 }
  0x23   :  { %294 = shalt.err (!%p291_p1)
}
  0x24   :  { %s327_s0 = smov 128   ;;  %s328_s10 = smov 8  }
  0x25   :  { %36 = dma.hbm_to_vmem [thread:$0]  %s400_s2, 2048, %s31_s28, [#allocation6], %s327_s0, %s327_s0, %s328_s10  }
  0x26   :  { %317 = dma.done.wait [#allocation3], 128  }
  0x27   :  { %318 = vsyncadd [#allocation3], 4294967168 }
  0x28   :  { %319 = dma.done.wait [#allocation6], 2048  }
  0x29   :  { %320 = vsyncadd [#allocation6], 4294965248  ;;  %v329_v0 = vmov 0.0|0.0   ;;  %vm330_vm0 = vmmov 0   ;;  %v331_v1 = vmov 0.0   ;;  %v45_v2 = vld [vmem:[#allocation5] sm:$0xff] }
  0x2a   :  { %215 = vmatprep.subr.bf16.mxu0 %v329_v0  ;;  %212 = vmatprep.mubr.msk.f32.mxu0 %vm330_vm0, %v331_v1  ;;  %v46_v3 = vld [vmem:[#allocation5 + $0x8] sm:$0xff]  ;;  %v47_v4 = vld [vmem:[#allocation5 + $0x10] sm:$0xff]  ;;  %v48_v6 = vld [vmem:[#allocation5 + $0x18] sm:$0xff] }
  0x2b   :  { %v216_v5 = vpack.c.bf16 %v46_v3, %v45_v2  ;;  %v219_v7 = vpack.c.bf16 %v48_v6, %v47_v4  ;;  %v49_v8 = vld [vmem:[#allocation5 + $0x20] sm:$0xff]  ;;  %v50_v9 = vld [vmem:[#allocation5 + $0x28] sm:$0xff]  ;;  %v51_v11 = vld [vmem:[#allocation5 + $0x30] sm:$0xff] }
  0x2c   :  { %v222_v10 = vpack.c.bf16 %v50_v9, %v49_v8  ;;  %v52_v12 = vld [vmem:[#allocation5 + $0x38] sm:$0xff]  ;;  %v53_v14 = vld [vmem:[#allocation5 + $0x40] sm:$0xff]  ;;  %v54_v15 = vld [vmem:[#allocation5 + $0x48] sm:$0xff] }
  0x2d   :  { %217 = vmatpush3.bf16.msra.mxu0 %v216_v5  ;;  %v225_v13 = vpack.c.bf16 %v52_v12, %v51_v11  ;;  %v228_v16 = vpack.c.bf16 %v54_v15, %v53_v14  ;;  %v55_v17 = vld [vmem:[#allocation5 + $0x50] sm:$0xff]  ;;  %v56_v18 = vld [vmem:[#allocation5 + $0x58] sm:$0xff]  ;;  %v57_v20 = vld [vmem:[#allocation5 + $0x60] sm:$0xff] }
  0x2e   :  { %218 = vmatprep.subr.bf16.mxu0 %v329_v0  ;;  %v231_v19 = vpack.c.bf16 %v56_v18, %v55_v17  ;;  %v58_v21 = vld [vmem:[#allocation5 + $0x68] sm:$0xff]  ;;  %v59_v23 = vld [vmem:[#allocation5 + $0x70] sm:$0xff]  ;;  %v60_v24 = vld [vmem:[#allocation5 + $0x78] sm:$0xff] }
  0x2f   :  { %v234_v22 = vpack.c.bf16 %v58_v21, %v57_v20  ;;  %v237_v25 = vpack.c.bf16 %v60_v24, %v59_v23  ;;  %v43_v26 = vld [vmem:[#allocation2] sm:$0xff] }
  0x30   :  { %v44_v27 = vmul.f32 %v43_v26, %v43_v26  ;;  %v162_v33 = vld [vmem:[%s399_s1] ss:$0 sm:$0xff] }
  0x31   :  { %220 = vmatpush3.bf16.msra.mxu0 %v219_v7 }
  0x32   :  { %221 = vmatprep.subr.bf16.mxu0 %v329_v0 }
  0x35   :  { %223 = vmatpush3.bf16.msra.mxu0 %v222_v10 }
  0x36   :  { %224 = vmatprep.subr.bf16.mxu0 %v329_v0 }
  0x39   :  { %226 = vmatpush3.bf16.msra.mxu0 %v225_v13 }
  0x3a   :  { %227 = vmatprep.subr.bf16.mxu0 %v329_v0 }
  0x3d   :  { %229 = vmatpush3.bf16.msra.mxu0 %v228_v16 }
  0x3e   :  { %230 = vmatprep.subr.bf16.mxu0 %v329_v0 }
  0x41   :  { %232 = vmatpush3.bf16.msra.mxu0 %v231_v19 }
  0x42   :  { %233 = vmatprep.subr.bf16.mxu0 %v329_v0 }
  0x45   :  { %235 = vmatpush3.bf16.msra.mxu0 %v234_v22 }
  0x46   :  { %236 = vmatprep.subr.bf16.mxu0 %v329_v0 }
  0x49   :  { %238 = vmatpush3.bf16.msra.mxu0 %v237_v25 }
  0x4c   :  { %213 = vmatmul.mubr.f32.vlgmr.msra.gmra.mrb[0].mxu0 %v44_v27 }
 0x11f   :  { %v127_v28 = vpop.f32.mrb[0].mxu0 }
 0x120   :  { %v131_v29 = vmul.f32 0.03125, %v127_v28  ;;  %v214_v30 = vpop.f32.mrb[1].mxu0 }
 0x122   :  { %v132_v31 = vadd.f32 1e-06, %v131_v29 }
 0x124   :  { %249 = vrsqrt.f32 %v132_v31 }
 0x12e   :  { %v250_v32 = vpop.eup %249 }
 0x12f   :  { %v134_v34 = vmul.f32 %v250_v32, %v43_v26 }
 0x131   :  { %v142_v35 = vmul.f32 %v162_v33, %v134_v34 }
 0x133   :  { %143 = vst [vmem:[#allocation7] sm:$0xff] %v142_v35 }
 0x134   :  { %148 = vsyncadd [#allocation4], 64  ;;  %s332_s14 = smov [#allocation7]  }
 0x135   :  { %s149_s15 = sshll.u32 %s332_s14, 4  ;;  %s150_s15 = int_to_ptr.vmem [resolvable:$true] %s149_s15 }
 0x136   :  { %s295_s16 = scalar_lea.vmem %s150_s15, 64  ;;  %s299_s17 = scalar_lea.vmem %s150_s15, 128 }
 0x137   :  { %p296_p2 = scmp.ne.s32.totalorder %s150_s15, %s295_s16  ;;  %p300_p3 = scmp.lt.s32.totalorder %s150_s15, %s150_s15 }
 0x138   :  { %p301_p4 = scmp.lt.s32.totalorder %s299_s17, %s295_s16 }
 0x13a   :  { %p302_p5 = por %p301_p4, %p300_p3 }
 0x13c   :  { %p303_p6 = pnand %p302_p5, %p296_p2 }
 0x13e   :  { %306 = shalt.err (!%p303_p6)
}
 0x13f   :  { %s307_s20 = scalar_lea.hbm %s401_s3, 64 }
 0x140   :  { %p308_p7 = scmp.ne.s32.totalorder %s401_s3, %s307_s20  ;;  %p311_p8 = scmp.lt.u32.totalorder %s307_s20, %s401_s3 }
 0x142   :  { %p313_p9 = pnand %p311_p8, %p308_p7 }
 0x144   :  { %316 = shalt.err (!%p313_p9)
}
 0x145   :  { %155 = dma.vmem_to_hbm [thread:$0]  %s150_s15, 64, %s401_s3, [#allocation4], %s324_s23, %s324_s23, %s325_s24  }
 0x146   :  { %321 = dma.done.wait [#allocation4], 128  }
 0x147   :  { %322 = vsyncadd [#allocation4], 4294967168 }
 0x148   :  { %159 = vsyncpa [#allocation3], 1 }
 0x149   :  { %160 = vsyncpa [#allocation6], 1 }
 0x14a   :  { %161 = vsyncpa [#allocation4], 1 }

</bundles_post_ra>
